<compile_context>
chip_gen: v7x
topology: tpu7x:2x2x1
jax: 0.10.0
libtpu: 0.0.40
codegen_flags: <defaults>
</compile_context>

<pallas_src>
import functools

import jax
import jax.numpy as jnp
from jax.experimental import pallas as pl
from jax.experimental.pallas import tpu as pltpu

NEURONS_U = 15
NEURONS_P = 15
HIDDEN = NEURONS_U + NEURONS_P       # 30
IN_DIM = 3
OUT_DIM = 3

HID_PAD = 32                         # hidden padded to 32 sublanes inside the kernel
OUT_PAD = 8                          # output rows padded to 8 inside the kernel only

# Packed weight slab: (128, 32) f32, each layer in its own 32-row aligned band.
W_ROWS = 4 * HID_PAD                 # 128
W_COLS = HID_PAD                     # 32
R_W1, R_W2, R_W3, R_W4 = 0, 32, 64, 96
# Packed bias slab: (32, 4) f32, one column per layer.
B_ROWS, B_COLS = HID_PAD, 4


def _round_up(n, m):
    return ((n + m - 1) // m) * m


def mlp_kernel(x_ref, w_ref, b_ref, o_ref, *, compute_dtype):
    """Fused forward on one (features, lane_tile) batch tile.

    x_ref: (3, L)    input tile, batch on the 128-lane axis
    w_ref: (128, 32) packed weights (zero-padded)
    b_ref: (32, 4)   packed biases  (zero-padded)
    o_ref: (3, L)    output tile
    """
    cdt = compute_dtype

    w = w_ref[...].astype(cdt)                       # (128, 32)
    b = b_ref[...]                                   # (32, 4) f32

    w1 = w[R_W1:R_W1 + HID_PAD, 0:IN_DIM]            # (32, 3)
    w2 = w[R_W2:R_W2 + HID_PAD, :]                   # (32, 32)
    w3 = w[R_W3:R_W3 + HID_PAD, :]                   # (32, 32)
    w4 = w[R_W4:R_W4 + OUT_PAD, :]                   # (8, 32)
    b1 = b[:, 0:1]                                   # (32, 1) lane-broadcast
    b2 = b[:, 1:2]
    b3 = b[:, 2:3]
    b4 = b[0:OUT_PAD, 3:4]                           # (8, 1)

    x = x_ref[...].astype(cdt)                       # (3, L)

    # f32 MXU accumulation; tanh (EUP) runs in compute_dtype (bf16 on v6e/v7x).
    h = jnp.tanh((jnp.dot(w1, x, preferred_element_type=jnp.float32) + b1).astype(cdt))  # (32, L)
    h = jnp.tanh((jnp.dot(w2, h, preferred_element_type=jnp.float32) + b2).astype(cdt))  # (32, L)
    h = jnp.tanh((jnp.dot(w3, h, preferred_element_type=jnp.float32) + b3).astype(cdt))  # (32, L)
    y = jnp.dot(w4, h, preferred_element_type=jnp.float32) + b4                          # (8, L) f32

    o_ref[...] = y[0:OUT_DIM, :].astype(o_ref.dtype)  # write only the 3 real rows


@functools.partial(jax.jit, static_argnames=("lane_tile", "compute_dtype"))
def netn_forward_t(x_t, wslab, bslab, *, lane_tile=4096, compute_dtype=jnp.float32):
    """Transposed-layout entry: x_t is (3, B) float32, returns (3, B) float32.

    Callers that keep the (features, batch) layout across their pipeline pay
    zero wrapper transpose/pad passes here (except lane padding when B % tile != 0).
    """
    B = x_t.shape[1]

    # Large tiles amortize the ~0.35 us/step grid overhead; the two_way cap keeps
    # the grid >= 2 where possible so v7x's 2 TensorCores both get work
    # (harmless on v5e/v6e). VMEM is never the constraint at these sizes.
    b128 = _round_up(B, 128)
    two_way = _round_up(pl.cdiv(b128, 2), 128)
    tile = _round_up(min(lane_tile, max(128, two_way)), 128)
    b_pad = _round_up(B, tile)

    if b_pad != B:
        x_p = jnp.zeros((IN_DIM, b_pad), x_t.dtype).at[:, :B].set(x_t)
    else:
        x_p = x_t

    out_t = pl.pallas_call(
        functools.partial(mlp_kernel, compute_dtype=compute_dtype),
        out_shape=jax.ShapeDtypeStruct((OUT_DIM, b_pad), jnp.float32),
        grid=(b_pad // tile,),
        in_specs=[
            pl.BlockSpec((IN_DIM, tile), lambda i: (0, i)),    # x tile, batch on lanes
            pl.BlockSpec((W_ROWS, W_COLS), lambda i: (0, 0)),  # resident weight slab
            pl.BlockSpec((B_ROWS, B_COLS), lambda i: (0, 0)),  # resident bias slab
        ],
        out_specs=pl.BlockSpec((OUT_DIM, tile), lambda i: (0, i)),
        compiler_params=pltpu.CompilerParams(
            dimension_semantics=("parallel",),   # shards batch tiles across v7x's 2 TCs
        ),
    )(x_p, wslab, bslab)

    return out_t[:, :B]


@functools.partial(jax.jit, static_argnames=("lane_tile", "compute_dtype"))
def netn_forward(x, wslab, bslab, *, lane_tile=4096, compute_dtype=jnp.float32):
    """PyTorch-layout entry: x is (B, 3) float32, returns (B, 3) float32."""
    out_t = netn_forward_t(x.T, wslab, bslab,
                           lane_tile=lane_tile, compute_dtype=compute_dtype)
    return out_t.T


def default_compute_dtype():
    """bf16 compute on chips with bf16 EUP/VPU (v6e / v7x), f32 elsewhere (v5e & older)."""
    try:
        kind = jax.devices()[0].device_kind.lower()
    except Exception:
        return jnp.float32
    if any(tag in kind for tag in ("v6", "v7", "7x", "trillium")):
        return jnp.bfloat16
    return jnp.float32


def init_params(key):
    """Weights in PyTorch nn.Linear layout (out, in) + packed, pre-padded slabs."""
    def linear(key, fan_in, fan_out):
        kw, kb = jax.random.split(key)
        bound = 1.0 / jnp.sqrt(float(fan_in))   # same scale as torch default uniform init
        w = jax.random.uniform(kw, (fan_out, fan_in), jnp.float32, -bound, bound)
        b = jax.random.uniform(kb, (fan_out,), jnp.float32, -bound, bound)
        return w, b

    k1, k2, k3, k4 = jax.random.split(key, 4)
    w1, b1 = linear(k1, IN_DIM, HIDDEN)      # (30, 3)
    w2, b2 = linear(k2, HIDDEN, HIDDEN)      # (30, 30)
    w3, b3 = linear(k3, HIDDEN, HIDDEN)      # (30, 30)
    w4, b4 = linear(k4, HIDDEN, OUT_DIM)     # (3, 30)

    # Aligned weight slab: each layer starts at lane 0 in its own 32-row band.
    wslab = jnp.zeros((W_ROWS, W_COLS), jnp.float32)
    wslab = wslab.at[R_W1:R_W1 + HIDDEN, :IN_DIM].set(w1)
    wslab = wslab.at[R_W2:R_W2 + HIDDEN, :HIDDEN].set(w2)
    wslab = wslab.at[R_W3:R_W3 + HIDDEN, :HIDDEN].set(w3)
    wslab = wslab.at[R_W4:R_W4 + OUT_DIM, :HIDDEN].set(w4)

    bslab = jnp.zeros((B_ROWS, B_COLS), jnp.float32)
    bslab = bslab.at[:HIDDEN, 0].set(b1)
    bslab = bslab.at[:HIDDEN, 1].set(b2)
    bslab = bslab.at[:HIDDEN, 2].set(b3)
    bslab = bslab.at[:OUT_DIM, 3].set(b4)

    return dict(w1=w1, b1=b1, w2=w2, b2=b2, w3=w3, b3=b3, w4=w4, b4=b4,
                wslab=wslab, bslab=bslab)


def netn_reference(x, p):
    """Pure-JAX f32 reference identical to the PyTorch forward (x @ W^T + b)."""
    h = jnp.tanh(x @ p["w1"].T + p["b1"])
    h = jnp.tanh(h @ p["w2"].T + p["b2"])
    h = jnp.tanh(h @ p["w3"].T + p["b3"])
    return h @ p["w4"].T + p["b4"]


if __name__ == "__main__":
    key = jax.random.PRNGKey(0)
    kx, kp = jax.random.split(key)

    # A batch of (x, y, t)-style 3-vector collocation points; 1000 pads to 1024,
    # and the grid>=2 guard gives two 512-lane steps (both v7x TCs get work).
    B = 1000
    x = jax.random.uniform(kx, (B, IN_DIM), jnp.float32)
    params = init_params(kp)

    cdt = default_compute_dtype()
    out = netn_forward(x, params["wslab"], params["bslab"],
                       lane_tile=4096, compute_dtype=cdt)
    out = jax.block_until_ready(out)

    ref = netn_reference(x, params)
    tol = 1e-4 if cdt == jnp.float32 else 3e-2   # bf16 tanh/MXU loses ~2^-9 rel precision
    assert out.shape == (B, OUT_DIM)
    assert jnp.allclose(out, ref, atol=tol, rtol=tol), float(jnp.max(jnp.abs(out - ref)))

    print("KERNEL_OK")
</pallas_src>

<mosaic_0001>
module attributes {stable_mosaic.version = 11 : i64} {
  func.func @mlp_kernel(%arg0: i32, %arg1: memref<3x512xf32, #tpu.memory_space<vmem>>, %arg2: memref<128x32xf32, #tpu.memory_space<vmem>>, %arg3: memref<32x4xf32, #tpu.memory_space<vmem>>, %arg4: memref<3x512xf32, #tpu.memory_space<vmem>>) attributes {dimension_semantics = [#tpu.dimension_semantics<parallel>], iteration_bounds = array<i64: 2>, scalar_prefetch = 0 : i64, scratch_operands = 0 : i64, tpu.core_type = #tpu.core_type<tc>, window_params = [{transform_indices = @transform_0, window_bounds = array<i64: 3, 512>}, {pipeline_mode = #tpu.pipeline_mode<synchronous>, transform_indices = @transform_1, window_bounds = array<i64: 128, 32>}, {pipeline_mode = #tpu.pipeline_mode<synchronous>, transform_indices = @transform_2, window_bounds = array<i64: 32, 4>}, {transform_indices = @transform_3, window_bounds = array<i64: 3, 512>}]} {
    %c0 = arith.constant 0 : index
    %c0_0 = arith.constant 0 : index
    %0 = vector.load %arg2[%c0, %c0_0] : memref<128x32xf32, #tpu.memory_space<vmem>>, vector<128x32xf32>
    %c0_1 = arith.constant 0 : index
    %c0_2 = arith.constant 0 : index
    %1 = vector.load %arg3[%c0_1, %c0_2] : memref<32x4xf32, #tpu.memory_space<vmem>>, vector<32x4xf32>
    %2 = vector.extract_strided_slice %0 {offsets = [0, 0], sizes = [32, 3], strides = [1, 1]} : vector<128x32xf32> to vector<32x3xf32>
    %3 = vector.extract_strided_slice %0 {offsets = [32, 0], sizes = [32, 32], strides = [1, 1]} : vector<128x32xf32> to vector<32x32xf32>
    %4 = vector.extract_strided_slice %0 {offsets = [64, 0], sizes = [32, 32], strides = [1, 1]} : vector<128x32xf32> to vector<32x32xf32>
    %5 = vector.extract_strided_slice %0 {offsets = [96, 0], sizes = [8, 32], strides = [1, 1]} : vector<128x32xf32> to vector<8x32xf32>
    %6 = vector.extract_strided_slice %1 {offsets = [0, 0], sizes = [32, 1], strides = [1, 1]} : vector<32x4xf32> to vector<32x1xf32>
    %7 = vector.extract_strided_slice %1 {offsets = [0, 1], sizes = [32, 1], strides = [1, 1]} : vector<32x4xf32> to vector<32x1xf32>
    %8 = vector.extract_strided_slice %1 {offsets = [0, 2], sizes = [32, 1], strides = [1, 1]} : vector<32x4xf32> to vector<32x1xf32>
    %9 = vector.extract_strided_slice %1 {offsets = [0, 3], sizes = [8, 1], strides = [1, 1]} : vector<32x4xf32> to vector<8x1xf32>
    %c0_3 = arith.constant 0 : index
    %c0_4 = arith.constant 0 : index
    %10 = vector.load %arg1[%c0_3, %c0_4] : memref<3x512xf32, #tpu.memory_space<vmem>>, vector<3x512xf32>
    %cst = arith.constant dense<0.000000e+00> : vector<32x512xf32>
    %11 = tpu.matmul %2, %10, %cst {dimension_numbers = #tpu.dot_dimension_numbers<[1], [0], [0], [1], [0, 0, 1, 1], [], []>} : vector<32x3xf32>, vector<3x512xf32>, vector<32x512xf32> -> vector<32x512xf32>
    %12 = vector.broadcast %6 : vector<32x1xf32> to vector<32x512xf32>
    %13 = arith.addf %11, %12 : vector<32x512xf32>
    %14 = math.tanh %13 : vector<32x512xf32>
    %cst_5 = arith.constant dense<0.000000e+00> : vector<32x512xf32>
    %15 = tpu.matmul %3, %14, %cst_5 {dimension_numbers = #tpu.dot_dimension_numbers<[1], [0], [0], [1], [0, 0, 1, 1], [], []>} : vector<32x32xf32>, vector<32x512xf32>, vector<32x512xf32> -> vector<32x512xf32>
    %16 = vector.broadcast %7 : vector<32x1xf32> to vector<32x512xf32>
    %17 = arith.addf %15, %16 : vector<32x512xf32>
    %18 = math.tanh %17 : vector<32x512xf32>
    %cst_6 = arith.constant dense<0.000000e+00> : vector<32x512xf32>
    %19 = tpu.matmul %4, %18, %cst_6 {dimension_numbers = #tpu.dot_dimension_numbers<[1], [0], [0], [1], [0, 0, 1, 1], [], []>} : vector<32x32xf32>, vector<32x512xf32>, vector<32x512xf32> -> vector<32x512xf32>
    %20 = vector.broadcast %8 : vector<32x1xf32> to vector<32x512xf32>
    %21 = arith.addf %19, %20 : vector<32x512xf32>
    %22 = math.tanh %21 : vector<32x512xf32>
    %cst_7 = arith.constant dense<0.000000e+00> : vector<8x512xf32>
    %23 = tpu.matmul %5, %22, %cst_7 {dimension_numbers = #tpu.dot_dimension_numbers<[1], [0], [0], [1], [0, 0, 1, 1], [], []>} : vector<8x32xf32>, vector<32x512xf32>, vector<8x512xf32> -> vector<8x512xf32>
    %24 = vector.broadcast %9 : vector<8x1xf32> to vector<8x512xf32>
    %25 = arith.addf %23, %24 : vector<8x512xf32>
    %26 = vector.extract_strided_slice %25 {offsets = [0, 0], sizes = [3, 512], strides = [1, 1]} : vector<8x512xf32> to vector<3x512xf32>
    %c0_8 = arith.constant 0 : index
    %c0_9 = arith.constant 0 : index
    %27 = vector.load %arg4[%c0_8, %c0_9] : memref<3x512xf32, #tpu.memory_space<vmem>>, vector<3x512xf32>
    tpu.vector_store %arg4[%c0_8, %c0_9], %26 {strides = array<i32>} : memref<3x512xf32, #tpu.memory_space<vmem>>, vector<3x512xf32>,
    return
  }
  func.func @transform_0(%arg0: i32) -> (i32, i32) {
    %c0_i32 = arith.constant 0 : i32
    %c0_i32_0 = arith.constant 0 : i32
    return %c0_i32, %arg0 : i32, i32
  }
  func.func @transform_1(%arg0: i32) -> (i32, i32) {
    %c0_i32 = arith.constant 0 : i32
    %c0_i32_0 = arith.constant 0 : i32
    %c0_i32_1 = arith.constant 0 : i32
    return %c0_i32, %c0_i32_0 : i32, i32
  }
  func.func @transform_2(%arg0: i32) -> (i32, i32) {
    %c0_i32 = arith.constant 0 : i32
    %c0_i32_0 = arith.constant 0 : i32
    %c0_i32_1 = arith.constant 0 : i32
    return %c0_i32, %c0_i32_0 : i32, i32
  }
  func.func @transform_3(%arg0: i32) -> (i32, i32) {
    %c0_i32 = arith.constant 0 : i32
    %c0_i32_0 = arith.constant 0 : i32
    return %c0_i32, %arg0 : i32, i32
  }
}

</mosaic_0001>

<bundles_post_ra>
// kernel: netn_forward_t.1
= control target key start
LH: loop header
LB: loop body
LE: loop exit
PB: predicated region body
PF: predicated region fallthrough
CT: control target
= control target key end

     0   :  { %8 = vsyncpa [#allocation3], 0  ;;  %s1662_s0 = inlined_call_operand.vmem [shape: f32[3,1024], index: 0, kind: input, shape index: {}]   ;;  %s1663_s1 = inlined_call_operand.vmem [shape: f32[128,32], index: 1, kind: input, shape index: {}]   ;;  %s1664_s2 = inlined_call_operand.vmem [shape: f32[32,4], index: 2, kind: input, shape index: {}]   ;;  %s1665_s3 = inlined_call_operand.hbm [shape: f32[3,1024], index: 3, kind: output, shape index: {}]  }
   0x1   :  { %10 = vsyncpa [#allocation3 + $0x1], 0  ;;  %s1439_s12 = smov 0   ;;  %s1441_s13 = smov 0  }
   0x2   :  { %s1443_s14 = smov 0   ;;  %s1445_s15 = smov 0  }
   0x3 LB: > { %s1460_s16 = sadd.s32 4294967295, %s1411_s15   ;;  %s1109_s17 = sadd.s32 4294967294, %s1411_s15   ;;  %s1411_s15 = sphi %s1445_s15, %s1671_s15   ;;  %s1407_s14 = sphi %s1443_s14, %s1670_s14   ;;  %s1403_s13 = sphi %s1441_s13, %s1669_s13   ;;  %s1399_s12 = sphi %s1439_s12, %s1668_s12  }
   0x4   : > { %s1464_s18 = sadd.s32 1, %s1411_s15   ;;  %s91_s19 = sadd.s32 1, %s1407_s14 }
   0x5   : > { %s88_s20 = ssub.s32 %s1411_s15, %s1464_s18  ;;  %p101_p0 = scmp.ne.s32.totalorder %s1407_s14, %s1403_s13 }
   0x6   : > { %p89_p1 = scmp.eq.s32.totalorder %s88_s20, 0  ;;  %p102_p2 = scmp.eq.s32.totalorder %s1460_s16, 1 }
   0x7   : > { %p107_p3 = scmp.ne.s32.totalorder %s1403_s13, %s1399_s12  ;;  %p108_p4 = scmp.eq.s32.totalorder %s1109_s17, 1 }
   0x8   : > { %s1475_s21 = scalar_select %p89_p1, %s1407_s14, %s91_s19  }
   0x9   : > { %p1477_p5 = por %p102_p2, %p101_p0  ;;  %p1481_p6 = por %p108_p4, %p107_p3 }
   0xa   : > { %p1112_p7 = scmp.ge.s32.totalorder %s1411_s15, 1  ;;  %p141_p8 = scmp.lt.s32.totalorder %s1411_s15, 3 }
   0xc   : > { %p142_p9 = pnand %p1112_p7, %p141_p8 }
   0xd   : > { %s1114_s24 = sshll.u32 (!%p142_p9), %s1460_s16, 2  ;;  %v1413_v0 = vmov (!%p142_p9), 0.0   ;;  %v1493_v1 = vld [vmem:[%s1664_s2] sm:$0xff] (!%p142_p9)  ;;  %v1414_v2 = vmov (!%p142_p9), 0   ;;  %v1498_v3 = vld [vmem:[%s1664_s2 + $0x10] sm:$0xff] (!%p142_p9)  ;;  %v1505_v4 = vld [vmem:[%s1664_s2 + $0x8] sm:$0xff] (!%p142_p9) }
   0xe   : > { %145 = sbr.rel (%p142_p9) target bundleno = 996 (0x3e4), region = 32  ;;  %p166_p10 = scmp.lt.s32.totalorder (!%p142_p9), %s1114_s24, 7  ;;  %301 = vmatprep.mubr.f32.mxu0 (!%p142_p9), %v1413_v0  ;;  %390 = vmatprep.mubr.f32.mxu1 (!%p142_p9), %v1413_v0  ;;  %v1510_v5 = vld [vmem:[%s1664_s2 + $0x18] sm:$0xff] (!%p142_p9)  ;;  %vm228_vm0 = vcmask (!%p142_p9), 1042432   ;;  %v172_v10 = vld [vmem:[%s1663_s1] sm:$0xff] (!%p142_p9)  ;;  %vm215_vm1 = vcmask (!%p142_p9), 23552  }
   0xf   : > { %1244 = vset.pattern.permute.xlu0 (!%p142_p9), %v1414_v2  ;;  %1245 = vset.pattern.permute.xlu1 (!%p142_p9), %v1414_v2  ;;  %v173_v11 = vld [vmem:[%s1663_s1 + $0x8] sm:$0xff] (!%p142_p9)  ;;  %v174_v12 = vld [vmem:[%s1663_s1 + $0x10] sm:$0xff] (!%p142_p9)  ;;  %v175_v13 = vld [vmem:[%s1663_s1 + $0x18] sm:$0xff] (!%p142_p9)  ;;  %v1415_v14 = vmov (!%p142_p9), 1   ;;  %vm447_vm2 = vcmask (!%p142_p9), 261120   ;;  %s162_s27 = sand.u32 (!%p142_p9), 1, %s1403_s13  }
  0x10   : > { %193 = vperm.xlu0 (!%p142_p9), %1244, %v1493_v1   ;;  %203 = vperm.xlu1 (!%p142_p9), %1245, %v1498_v3   ;;  %s1113_s28 = sshll.u32 (!%p142_p9), %s162_s27, 4  ;;  %s1151_s29 = sshll.u32 (!%p142_p9), %s1460_s16, 8 }
  0x11   : > { %s164_s30 = scalar_lea.vmem (!%p142_p9), [#allocation2], %s1113_s28  ;;  %s1620_s7 = scalar_lea.hbm (!%p142_p9), %s1665_s3, %s1151_s29 }
  0x12   : > { %s1050_s4 = sshll.u32 (!%p142_p9), %s164_s30, 4  ;;  %s1036_s8 = scalar_lea.sflag (!%p142_p9), [#allocation3], %s162_s27  ;;  %s1622_s4 = int_to_ptr.vmem [resolvable:$true] %s1050_s4 }
  0x13   : > { %s1418_s16 = smov (!%p142_p9), [#allocation2]  }
  0x14   : > { %198 = vperm.xlu0 (!%p142_p9), %1244, %v1505_v4   ;;  %208 = vperm.xlu1 (!%p142_p9), %1245, %v1510_v5   ;;  %s1353_s10 = sshll.u32 (!%p142_p9), %s1418_s16, 4  ;;  %s1354_s10 = int_to_ptr.vmem [resolvable:$false] %s1353_s10 }
  0x15   : > { %s1673_s24 = smov (!%p166_p10, %s1114_s24), 7  ;;  %s1355_s11 = scalar_lea.vmem %s1354_s10, 512 }
  0x16   : > { %s1115_s6 = sshll.u32 %s1673_s24, 2  ;;  %p1356_p0 = scmp.lt.s32.totalorder %s1622_s4, %s1354_s10 }
  0x17   : > { %s169_s9 = scalar_lea.vmem %s1662_s0, %s1115_s6 }
  0x18   : > { %v189_v6 = vld [vmem:[%s169_s9] sm:$0x77]  ;;  %v190_v7 = vld [vmem:[%s169_s9 + $0x8] sm:$0x77]  ;;  %1246 = vset.pattern.permute.xlu0 %v1415_v14  ;;  %1247 = vset.pattern.permute.xlu1 %v1415_v14  ;;  %s1349_s9 = scalar_lea.vmem %s1622_s4, 256 }
  0x19   : > { %v213_v8 = vcombine.high %v189_v6, %v189_v6  ;;  %v214_v9 = vcombine.high %v190_v7, %v190_v7  ;;  %432 = vperm.xlu0 %1246, %v1493_v1   ;;  %436 = vperm.xlu1 %1247, %v1505_v4   ;;  %p1350_p11 = scmp.ne.s32.totalorder %s1622_s4, %s1349_s9  ;;  %p1357_p1 = scmp.lt.s32.totalorder %s1355_s11, %s1349_s9 }
  0x1b   : > { %1116 = vmatprep.subr.msk.mxu0 %vm228_vm0, %v213_v8  ;;  %1122 = vmatprep.subr.msk.mxu1 %vm228_vm0, %v214_v9  ;;  %p1351_p12 = pnand %p1350_p11, %p1477_p5  ;;  %p1358_p2 = por %p1357_p1, %p1356_p0 }
  0x1c   : > { %1117 = vmatpush1.msk.msra.mxu0 %vm228_vm0, %v189_v6  ;;  %1123 = vmatpush1.msk.msra.mxu1 %vm228_vm0, %v190_v7 }
  0x1d   : > { %1118 = vmatmul.mubr.msk.f32.vlgmr.msra.gmra.mrb[0].mxu0 %vm215_vm1, %v172_v10  ;;  %1124 = vmatmul.mubr.msk.f32.vlgmr.msra.gmra.mrb[0].mxu1 %vm215_vm1, %v172_v10  ;;  %p1352_p13 = pneg %p1351_p12 }
  0x1e   : > { %307 = vmatprep.mubr.f32.mxu0 %v1413_v0  ;;  %396 = vmatprep.mubr.f32.mxu1 %v1413_v0 }
  0x1f   : > { %440 = vperm.xlu1 %1247, %v1498_v3   ;;  %444 = vperm.xlu0 %1246, %v1510_v5   ;;  %p1359_p3 = pnand %p1358_p2, %p1352_p13 }
  0x21   : > { %1119 = vmatmul.mubr.msk.f32.gmra.mrb[2].mxu0 %vm215_vm1, %v173_v11  ;;  %1125 = vmatmul.mubr.msk.f32.gmra.mrb[2].mxu1 %vm215_vm1, %v173_v11 }
  0x22   : > { %313 = vmatprep.mubr.f32.mxu0 %v1413_v0  ;;  %402 = vmatprep.mubr.f32.mxu1 %v1413_v0 }
  0x25   : > { %1120 = vmatmul.mubr.msk.f32.gmra.mrb[4].mxu0 %vm215_vm1, %v174_v12  ;;  %1126 = vmatmul.mubr.msk.f32.gmra.mrb[4].mxu1 %vm215_vm1, %v174_v12 }
  0x26   : > { %319 = vmatprep.mubr.f32.mxu0 %v1413_v0  ;;  %408 = vmatprep.mubr.f32.mxu1 %v1413_v0 }
  0x29   : > { %1121 = vmatmul.mubr.msk.f32.gmra.mrb[6].mxu0 %vm215_vm1, %v175_v13  ;;  %1127 = vmatmul.mubr.msk.f32.gmra.mrb[6].mxu1 %vm215_vm1, %v175_v13 }
  0x2a   : > { %524 = vmatprep.mubr.f32.mxu0 %v1413_v0  ;;  %613 = vmatprep.mubr.f32.mxu1 %v1413_v0 }
  0x8f   : > { %v194_v15 = vpop.permute.xlu0 %193  ;;  %v204_v25 = vpop.permute.xlu1 %203 }
  0x93   : > { %v199_v22 = vpop.permute.xlu0 %198  ;;  %v209_v42 = vpop.permute.xlu1 %208 }
  0xf0   : > { %v303_v16 = vpop.f32.mrb[0].mxu0  ;;  %v392_v17 = vpop.f32.mrb[0].mxu1 }
  0xf1   : > { %v304_v18 = vadd.f32 %v303_v16, %v194_v15  ;;  %v393_v19 = vadd.f32 %v392_v17, %v194_v15  ;;  %v305_v20 = vpop.f32.mrb[1].mxu0  ;;  %v394_v21 = vpop.f32.mrb[1].mxu1  ;;  %v176_v16 = vld [vmem:[%s1663_s1 + $0x20] sm:$0xff]  ;;  %v177_v17 = vld [vmem:[%s1663_s1 + $0x28] sm:$0xff] }
  0xf2   : > { %v306_v23 = vadd.f32 %v305_v20, %v194_v15  ;;  %v395_v24 = vadd.f32 %v394_v21, %v194_v15  ;;  %v1416_v20 = vmov 2   ;;  %v433_v21 = vpop.permute.xlu0 %432 }
  0xf3   : > { %1253 = vtanh.f32 %v304_v18  ;;  %v178_v18 = vld [vmem:[%s1663_s1 + $0x30] sm:$0xff]  ;;  %1248 = vset.pattern.permute.xlu1 %v1416_v20  ;;  %1249 = vset.pattern.permute.xlu0 %v1416_v20  ;;  %v181_v20 = vld [vmem:[%s1663_s1 + $0x48] sm:$0xff] }
  0xf4   : > { %1255 = vtanh.f32 %v393_v19  ;;  %v309_v26 = vpop.f32.mrb[2].mxu0  ;;  %v398_v27 = vpop.f32.mrb[2].mxu1  ;;  %v179_v19 = vld [vmem:[%s1663_s1 + $0x38] sm:$0xff]  ;;  %655 = vperm.xlu1 %1248, %v1493_v1   ;;  %659 = vperm.xlu0 %1249, %v1505_v4  }
  0xf5   : > { %1257 = vtanh.f32 %v306_v23  ;;  %v310_v28 = vadd.f32 %v309_v26, %v199_v22  ;;  %v399_v29 = vadd.f32 %v398_v27, %v199_v22  ;;  %v311_v30 = vpop.f32.mrb[3].mxu0  ;;  %v400_v31 = vpop.f32.mrb[3].mxu1 }
  0xf6   : > { %1259 = vtanh.f32 %v395_v24  ;;  %v312_v32 = vadd.f32 %v311_v30, %v199_v22  ;;  %v401_v33 = vadd.f32 %v400_v31, %v199_v22  ;;  %v437_v23 = vpop.permute.xlu1 %436 }
  0xf7   : > { %1261 = vtanh.f32 %v310_v28 }
  0xf8   : > { %1263 = vtanh.f32 %v399_v29  ;;  %v315_v34 = vpop.f32.mrb[4].mxu0  ;;  %v404_v35 = vpop.f32.mrb[4].mxu1  ;;  %663 = vperm.xlu1 %1248, %v1498_v3  }
  0xf9   : > { %1265 = vtanh.f32 %v312_v32  ;;  %v316_v36 = vadd.f32 %v315_v34, %v204_v25  ;;  %v405_v37 = vadd.f32 %v404_v35, %v204_v25  ;;  %v317_v38 = vpop.f32.mrb[5].mxu0  ;;  %v406_v39 = vpop.f32.mrb[5].mxu1 }
  0xfa   : > { %1267 = vtanh.f32 %v401_v33  ;;  %v318_v40 = vadd.f32 %v317_v38, %v204_v25  ;;  %v407_v41 = vadd.f32 %v406_v39, %v204_v25 }
  0xfb   : > { %1269 = vtanh.f32 %v316_v36 }
  0xfc   : > { %1271 = vtanh.f32 %v405_v37  ;;  %v321_v43 = vpop.f32.mrb[6].mxu0  ;;  %v410_v44 = vpop.f32.mrb[6].mxu1  ;;  %667 = vperm.xlu1 %1248, %v1510_v5  }
  0xfd   : > { %v1254_v45 = vpop.eup %1253  ;;  %1273 = vtanh.f32 %v318_v40  ;;  %v322_v46 = vadd.f32 %v321_v43, %v209_v42  ;;  %v411_v47 = vadd.f32 %v410_v44, %v209_v42  ;;  %v323_v48 = vpop.f32.mrb[7].mxu0 }
  0xfe   : > { %v412_v49 = vpop.f32.mrb[7].mxu1  ;;  %v1256_v50 = vpop.eup %1255  ;;  %1275 = vtanh.f32 %v407_v41  ;;  %v324_v51 = vadd.f32 %v323_v48, %v209_v42 }
  0xff   : > { %v413_v52 = vadd.f32 %v412_v49, %v209_v42  ;;  %v1258_v53 = vpop.eup %1257  ;;  %1277 = vtanh.f32 %v322_v46  ;;  %v441_v5 = vpop.permute.xlu1 %440 }
 0x100   : > { %v1260_v54 = vpop.eup %1259  ;;  %1279 = vtanh.f32 %v411_v47 }
 0x101   : > { %v1262_v55 = vpop.eup %1261  ;;  %1281 = vtanh.f32 %v324_v51 }
 0x102   : > { %v1264_v56 = vpop.eup %1263  ;;  %1283 = vtanh.f32 %v413_v52  ;;  %v1154_v57 = vpack.c.bf16 %v1262_v55, %v1254_v45  ;;  %v445_v45 = vpop.permute.xlu0 %444 }
 0x103   : > { %v1266_v58 = vpop.eup %1265  ;;  %v1162_v59 = vpack.c.bf16 %v1264_v56, %v1256_v50 }
 0x104   : > { %v1268_v60 = vpop.eup %1267  ;;  %v1152_v61 = vpack.c.bf16 %v1266_v58, %v1258_v53 }
 0x105   : > { %v1270_v62 = vpop.eup %1269  ;;  %v1160_v63 = vpack.c.bf16 %v1268_v60, %v1260_v54 }
 0x106   : > { %v1272_v2 = vpop.eup %1271  ;;  %1153 = vmatprep.subr.bf16.mxu0 %v1152_v61 }
 0x107   : > { %v1274_v6 = vpop.eup %1273  ;;  %1161 = vmatprep.subr.bf16.mxu1 %v1160_v63  ;;  %1155 = vmatpush1.bf16.msra.mxu0 %v1154_v57 }
 0x108   : > { %v1276_v7 = vpop.eup %1275  ;;  %1163 = vmatpush1.bf16.msra.mxu1 %v1162_v59 }
 0x109   : > { %v1278_v8 = vpop.eup %1277 }
 0x10a   : > { %v1280_v9 = vpop.eup %1279  ;;  %v1158_v10 = vpack.c.bf16 %v1278_v8, %v1270_v62 }
 0x10b   : > { %v1282_v11 = vpop.eup %1281  ;;  %v1166_v12 = vpack.c.bf16 %v1280_v9, %v1272_v2 }
 0x10c   : > { %v1284_v13 = vpop.eup %1283  ;;  %v1156_v14 = vpack.c.bf16 %v1282_v11, %v1274_v6 }
 0x10d   : > { %v1164_v15 = vpack.c.bf16 %v1284_v13, %v1276_v7 }
 0x10e   : > { %1157 = vmatprep.subr.bf16.mxu0 %v1156_v14 }
 0x10f   : > { %1165 = vmatprep.subr.bf16.mxu1 %v1164_v15  ;;  %1159 = vmatpush1.bf16.msra.mxu0 %v1158_v10 }
 0x110   : > { %1167 = vmatpush1.bf16.msra.mxu1 %v1166_v12 }
 0x112   : > { %1128 = vmatmul.mubr.msk.f32.vlgmr.msra.gmra.mrb[8].mxu0 %vm447_vm2, %v176_v16 }
 0x113   : > { %1132 = vmatmul.mubr.msk.f32.vlgmr.msra.gmra.mrb[8].mxu1 %vm447_vm2, %v176_v16  ;;  %530 = vmatprep.mubr.f32.mxu0 %v1413_v0 }
 0x114   : > { %619 = vmatprep.mubr.f32.mxu1 %v1413_v0 }
 0x116   : > { %1129 = vmatmul.mubr.msk.f32.gmra.mrb[10].mxu0 %vm447_vm2, %v177_v17 }
 0x117   : > { %1133 = vmatmul.mubr.msk.f32.gmra.mrb[10].mxu1 %vm447_vm2, %v177_v17  ;;  %536 = vmatprep.mubr.f32.mxu0 %v1413_v0 }
 0x118   : > { %625 = vmatprep.mubr.f32.mxu1 %v1413_v0 }
 0x11a   : > { %1130 = vmatmul.mubr.msk.f32.gmra.mrb[12].mxu0 %vm447_vm2, %v178_v18 }
 0x11b   : > { %1134 = vmatmul.mubr.msk.f32.gmra.mrb[12].mxu1 %vm447_vm2, %v178_v18  ;;  %542 = vmatprep.mubr.f32.mxu0 %v1413_v0 }
 0x11c   : > { %631 = vmatprep.mubr.f32.mxu1 %v1413_v0 }
 0x11e   : > { %1131 = vmatmul.mubr.msk.f32.gmra.mrb[14].mxu0 %vm447_vm2, %v179_v19 }
 0x11f   : > { %1135 = vmatmul.mubr.msk.f32.gmra.mrb[14].mxu1 %vm447_vm2, %v179_v19  ;;  %746 = vmatprep.mubr.f32.mxu0 %v1413_v0  ;;  %v180_v19 = vld [vmem:[%s1663_s1 + $0x40] sm:$0xff] }
 0x120   : > { %835 = vmatprep.mubr.f32.mxu1 %v1413_v0 }
 0x1e5   : > { %v526_v22 = vpop.f32.mrb[8].mxu0 }
 0x1e6   : > { %v527_v24 = vadd.f32 %v526_v22, %v433_v21  ;;  %v615_v25 = vpop.f32.mrb[8].mxu1  ;;  %v528_v26 = vpop.f32.mrb[9].mxu0  ;;  %v183_v22 = vld [vmem:[%s1663_s1 + $0x58] sm:$0xff] }
 0x1e7   : > { %v616_v27 = vadd.f32 %v615_v25, %v433_v21  ;;  %v529_v28 = vadd.f32 %v528_v26, %v433_v21  ;;  %v617_v29 = vpop.f32.mrb[9].mxu1 }
 0x1e8   : > { %1285 = vtanh.f32 %v527_v24  ;;  %v618_v30 = vadd.f32 %v617_v29, %v433_v21  ;;  %v182_v21 = vld [vmem:[%s1663_s1 + $0x50] sm:$0xff]  ;;  %v656_v24 = vpop.permute.xlu1 %655 }
 0x1e9   : > { %1287 = vtanh.f32 %v616_v27  ;;  %v532_v31 = vpop.f32.mrb[10].mxu0 }
 0x1ea   : > { %1289 = vtanh.f32 %v529_v28  ;;  %v533_v32 = vadd.f32 %v532_v31, %v437_v23  ;;  %v621_v4 = vpop.f32.mrb[10].mxu1  ;;  %v534_v33 = vpop.f32.mrb[11].mxu0 }
 0x1eb   : > { %1291 = vtanh.f32 %v618_v30  ;;  %v622_v3 = vadd.f32 %v621_v4, %v437_v23  ;;  %v535_v34 = vadd.f32 %v534_v33, %v437_v23  ;;  %v623_v35 = vpop.f32.mrb[11].mxu1 }
 0x1ec   : > { %1293 = vtanh.f32 %v533_v32  ;;  %v624_v36 = vadd.f32 %v623_v35, %v437_v23  ;;  %v1417_v23 = vmov 3   ;;  %v660_v32 = vpop.permute.xlu0 %659 }
 0x1ed   : > { %1295 = vtanh.f32 %v622_v3  ;;  %v538_v37 = vpop.f32.mrb[12].mxu0  ;;  %1250 = vset.pattern.permute.xlu0 %v1417_v23 }
 0x1ee   : > { %1297 = vtanh.f32 %v535_v34  ;;  %v539_v38 = vadd.f32 %v538_v37, %v441_v5  ;;  %v627_v39 = vpop.f32.mrb[12].mxu1  ;;  %v540_v40 = vpop.f32.mrb[13].mxu0  ;;  %877 = vperm.xlu0 %1250, %v1493_v1  }
 0x1ef   : > { %1299 = vtanh.f32 %v624_v36  ;;  %v628_v41 = vadd.f32 %v627_v39, %v441_v5  ;;  %v541_v42 = vadd.f32 %v540_v40, %v441_v5  ;;  %v629_v43 = vpop.f32.mrb[13].mxu1  ;;  %v664_v34 = vpop.permute.xlu1 %663 }
 0x1f0   : > { %1301 = vtanh.f32 %v539_v38  ;;  %v630_v44 = vadd.f32 %v629_v43, %v441_v5 }
 0x1f1   : > { %1303 = vtanh.f32 %v628_v41  ;;  %v544_v46 = vpop.f32.mrb[14].mxu0 }
 0x1f2   : > { %v1286_v47 = vpop.eup %1285  ;;  %1305 = vtanh.f32 %v541_v42  ;;  %v545_v48 = vadd.f32 %v544_v46, %v445_v45  ;;  %v633_v49 = vpop.f32.mrb[14].mxu1 }
 0x1f3   : > { %v546_v50 = vpop.f32.mrb[15].mxu0  ;;  %v1288_v51 = vpop.eup %1287  ;;  %1307 = vtanh.f32 %v630_v44  ;;  %v634_v52 = vadd.f32 %v633_v49, %v445_v45 }
 0x1f4   : > { %v547_v53 = vadd.f32 %v546_v50, %v445_v45  ;;  %v635_v54 = vpop.f32.mrb[15].mxu1  ;;  %v1290_v55 = vpop.eup %1289  ;;  %1309 = vtanh.f32 %v545_v48 }
 0x1f5   : > { %v636_v56 = vadd.f32 %v635_v54, %v445_v45  ;;  %v1292_v57 = vpop.eup %1291  ;;  %1311 = vtanh.f32 %v634_v52  ;;  %v668_v46 = vpop.permute.xlu1 %667 }
 0x1f6   : > { %v1294_v58 = vpop.eup %1293  ;;  %1313 = vtanh.f32 %v547_v53 }
 0x1f7   : > { %v1296_v59 = vpop.eup %1295  ;;  %1315 = vtanh.f32 %v636_v56  ;;  %v1170_v60 = vpack.c.bf16 %v1294_v58, %v1286_v47 }
 0x1f8   : > { %v1298_v61 = vpop.eup %1297  ;;  %v1178_v62 = vpack.c.bf16 %v1296_v59, %v1288_v51 }
 0x1f9   : > { %v1300_v63 = vpop.eup %1299  ;;  %v1168_v2 = vpack.c.bf16 %v1298_v61, %v1290_v55 }
 0x1fa   : > { %v1302_v6 = vpop.eup %1301  ;;  %v1176_v7 = vpack.c.bf16 %v1300_v63, %v1292_v57 }
 0x1fb   : > { %v1304_v8 = vpop.eup %1303  ;;  %1169 = vmatprep.subr.bf16.mxu0 %v1168_v2 }
 0x1fc   : > { %v1306_v9 = vpop.eup %1305  ;;  %1177 = vmatprep.subr.bf16.mxu1 %v1176_v7  ;;  %1171 = vmatpush1.bf16.msra.mxu0 %v1170_v60 }
 0x1fd   : > { %v1308_v10 = vpop.eup %1307  ;;  %1179 = vmatpush1.bf16.msra.mxu1 %v1178_v62 }
 0x1fe   : > { %v1310_v11 = vpop.eup %1309 }
 0x1ff   : > { %v1312_v12 = vpop.eup %1311  ;;  %v1174_v13 = vpack.c.bf16 %v1310_v11, %v1302_v6 }
 0x200   : > { %v1314_v14 = vpop.eup %1313  ;;  %v1182_v15 = vpack.c.bf16 %v1312_v12, %v1304_v8 }
 0x201   : > { %v1316_v16 = vpop.eup %1315  ;;  %v1172_v17 = vpack.c.bf16 %v1314_v14, %v1306_v9 }
 0x202   : > { %v1180_v18 = vpack.c.bf16 %v1316_v16, %v1308_v10 }
 0x203   : > { %1173 = vmatprep.subr.bf16.mxu0 %v1172_v17 }
 0x204   : > { %1181 = vmatprep.subr.bf16.mxu1 %v1180_v18  ;;  %1175 = vmatpush1.bf16.msra.mxu0 %v1174_v13 }
 0x205   : > { %1183 = vmatpush1.bf16.msra.mxu1 %v1182_v15 }
 0x207   : > { %1136 = vmatmul.mubr.msk.f32.vlgmr.msra.gmra.mrb[16].mxu0 %vm447_vm2, %v180_v19 }
 0x208   : > { %1140 = vmatmul.mubr.msk.f32.vlgmr.msra.gmra.mrb[16].mxu1 %vm447_vm2, %v180_v19  ;;  %752 = vmatprep.mubr.f32.mxu0 %v1413_v0 }
 0x209   : > { %841 = vmatprep.mubr.f32.mxu1 %v1413_v0 }
 0x20b   : > { %1137 = vmatmul.mubr.msk.f32.gmra.mrb[18].mxu0 %vm447_vm2, %v181_v20 }
 0x20c   : > { %1141 = vmatmul.mubr.msk.f32.gmra.mrb[18].mxu1 %vm447_vm2, %v181_v20  ;;  %758 = vmatprep.mubr.f32.mxu0 %v1413_v0  ;;  %v184_v20 = vld [vmem:[%s1663_s1 + $0x60] sm:$0xff] }
 0x20d   : > { %847 = vmatprep.mubr.f32.mxu1 %v1413_v0 }
 0x20f   : > { %1138 = vmatmul.mubr.msk.f32.gmra.mrb[20].mxu0 %vm447_vm2, %v182_v21 }
 0x210   : > { %1142 = vmatmul.mubr.msk.f32.gmra.mrb[20].mxu1 %vm447_vm2, %v182_v21  ;;  %764 = vmatprep.mubr.f32.mxu0 %v1413_v0 }
 0x211   : > { %853 = vmatprep.mubr.f32.mxu1 %v1413_v0 }
 0x213   : > { %1139 = vmatmul.mubr.msk.f32.gmra.mrb[22].mxu0 %vm447_vm2, %v183_v22 }
 0x214   : > { %1143 = vmatmul.mubr.msk.f32.gmra.mrb[22].mxu1 %vm447_vm2, %v183_v22  ;;  %947 = vmatprep.mubr.f32.mxu0 %v1413_v0 }
 0x215   : > { %1018 = vmatprep.mubr.f32.mxu1 %v1413_v0 }
 0x26d   : > { %v878_v21 = vpop.permute.xlu0 %877 }
 0x2da   : > { %v748_v25 = vpop.f32.mrb[16].mxu0 }
 0x2db   : > { %v749_v26 = vadd.f32 %v748_v25, %v656_v24  ;;  %v837_v27 = vpop.f32.mrb[16].mxu1  ;;  %v750_v28 = vpop.f32.mrb[17].mxu0 }
 0x2dc   : > { %v838_v29 = vadd.f32 %v837_v27, %v656_v24  ;;  %v751_v30 = vadd.f32 %v750_v28, %v656_v24  ;;  %v839_v31 = vpop.f32.mrb[17].mxu1 }
 0x2dd   : > { %1317 = vtanh.f32 %v749_v26  ;;  %v840_v4 = vadd.f32 %v839_v31, %v656_v24 }
 0x2de   : > { %1319 = vtanh.f32 %v838_v29  ;;  %v754_v33 = vpop.f32.mrb[18].mxu0 }
 0x2df   : > { %1321 = vtanh.f32 %v751_v30  ;;  %v755_v3 = vadd.f32 %v754_v33, %v660_v32  ;;  %v843_v0 = vpop.f32.mrb[18].mxu1  ;;  %v756_v5 = vpop.f32.mrb[19].mxu0 }
 0x2e0   : > { %1323 = vtanh.f32 %v840_v4  ;;  %v844_v1 = vadd.f32 %v843_v0, %v660_v32  ;;  %v757_v35 = vadd.f32 %v756_v5, %v660_v32  ;;  %v845_v36 = vpop.f32.mrb[19].mxu1 }
 0x2e1   : > { %1325 = vtanh.f32 %v755_v3  ;;  %v846_v37 = vadd.f32 %v845_v36, %v660_v32 }
 0x2e2   : > { %1327 = vtanh.f32 %v844_v1  ;;  %v760_v38 = vpop.f32.mrb[20].mxu0 }
 0x2e3   : > { %1329 = vtanh.f32 %v757_v35  ;;  %v761_v39 = vadd.f32 %v760_v38, %v664_v34  ;;  %v849_v40 = vpop.f32.mrb[20].mxu1  ;;  %v762_v41 = vpop.f32.mrb[21].mxu0 }
 0x2e4   : > { %1331 = vtanh.f32 %v846_v37  ;;  %v850_v42 = vadd.f32 %v849_v40, %v664_v34  ;;  %v763_v43 = vadd.f32 %v762_v41, %v664_v34  ;;  %v851_v44 = vpop.f32.mrb[21].mxu1 }
 0x2e5   : > { %1333 = vtanh.f32 %v761_v39  ;;  %v852_v45 = vadd.f32 %v851_v44, %v664_v34 }
 0x2e6   : > { %1335 = vtanh.f32 %v850_v42  ;;  %v766_v47 = vpop.f32.mrb[22].mxu0 }
 0x2e7   : > { %v1318_v48 = vpop.eup %1317  ;;  %1337 = vtanh.f32 %v763_v43  ;;  %v767_v49 = vadd.f32 %v766_v47, %v668_v46  ;;  %v855_v50 = vpop.f32.mrb[22].mxu1 }
 0x2e8   : > { %v768_v51 = vpop.f32.mrb[23].mxu0  ;;  %v1320_v52 = vpop.eup %1319  ;;  %1339 = vtanh.f32 %v852_v45  ;;  %v856_v53 = vadd.f32 %v855_v50, %v668_v46 }
 0x2e9   : > { %v769_v54 = vadd.f32 %v768_v51, %v668_v46  ;;  %v857_v55 = vpop.f32.mrb[23].mxu1  ;;  %v1322_v56 = vpop.eup %1321  ;;  %1341 = vtanh.f32 %v767_v49 }
 0x2ea   : > { %v858_v57 = vadd.f32 %v857_v55, %v668_v46  ;;  %v1324_v58 = vpop.eup %1323  ;;  %1343 = vtanh.f32 %v856_v53 }
 0x2eb   : > { %v1326_v59 = vpop.eup %1325  ;;  %1345 = vtanh.f32 %v769_v54 }
 0x2ec   : > { %v1328_v60 = vpop.eup %1327  ;;  %1347 = vtanh.f32 %v858_v57  ;;  %v1186_v61 = vpack.c.bf16 %v1326_v59, %v1318_v48 }
 0x2ed   : > { %v1330_v62 = vpop.eup %1329  ;;  %v1194_v63 = vpack.c.bf16 %v1328_v60, %v1320_v52 }
 0x2ee   : > { %v1332_v2 = vpop.eup %1331  ;;  %v1184_v6 = vpack.c.bf16 %v1330_v62, %v1322_v56 }
 0x2ef   : > { %v1334_v7 = vpop.eup %1333  ;;  %v1192_v8 = vpack.c.bf16 %v1332_v2, %v1324_v58 }
 0x2f0   : > { %v1336_v9 = vpop.eup %1335  ;;  %1185 = vmatprep.subr.bf16.mxu0 %v1184_v6 }
 0x2f1   : > { %v1338_v10 = vpop.eup %1337  ;;  %1193 = vmatprep.subr.bf16.mxu1 %v1192_v8  ;;  %1187 = vmatpush1.bf16.msra.mxu0 %v1186_v61 }
 0x2f2   : > { %v1340_v11 = vpop.eup %1339  ;;  %1195 = vmatpush1.bf16.msra.mxu1 %v1194_v63 }
 0x2f3   : > { %v1342_v12 = vpop.eup %1341 }
 0x2f4   : > { %v1344_v13 = vpop.eup %1343  ;;  %v1190_v14 = vpack.c.bf16 %v1342_v12, %v1334_v7 }
 0x2f5   : > { %v1346_v15 = vpop.eup %1345  ;;  %v1198_v16 = vpack.c.bf16 %v1344_v13, %v1336_v9 }
 0x2f6   : > { %v1348_v17 = vpop.eup %1347  ;;  %v1188_v18 = vpack.c.bf16 %v1346_v15, %v1338_v10 }
 0x2f7   : > { %v1196_v19 = vpack.c.bf16 %v1348_v17, %v1340_v11 }
 0x2f8   : > { %1189 = vmatprep.subr.bf16.mxu0 %v1188_v18 }
 0x2f9   : > { %1197 = vmatprep.subr.bf16.mxu1 %v1196_v19  ;;  %1191 = vmatpush1.bf16.msra.mxu0 %v1190_v14 }
 0x2fa   : > { %1199 = vmatpush1.bf16.msra.mxu1 %v1198_v16 }
 0x2fc   : > { %1144 = vmatmul.mubr.msk.f32.vlgmr.msra.gmra.mrb[24].mxu0 %vm447_vm2, %v184_v20 }
 0x2fd   : > { %1145 = vmatmul.mubr.msk.f32.vlgmr.msra.gmra.mrb[24].mxu1 %vm447_vm2, %v184_v20 }
 0x3cf   : > { %v949_v22 = vpop.f32.mrb[24].mxu0 }
 0x3d0   : > { %v1020_v23 = vpop.f32.mrb[24].mxu1  ;;  %v950_v24 = vadd.f32 %v949_v22, %v878_v21  ;;  %v951_v25 = vpop.f32.mrb[25].mxu0 }
 0x3d1   : > { %v1021_v26 = vadd.f32 %v1020_v23, %v878_v21  ;;  %v952_v27 = vadd.f32 %v951_v25, %v878_v21  ;;  %v1022_v28 = vpop.f32.mrb[25].mxu1 }
 0x3d2   : > { %v1023_v29 = vadd.f32 %v1022_v28, %v878_v21 }
 0x3d3   : > { %v1029_v30 = vcombine.low %v950_v24, %v952_v27 }
 0x3d4   : > { %v1030_v31 = vcombine.low %v1021_v26, %v1023_v29 }
 0x3d5   : > { %1033 = vst [vmem:[%s164_s30] sm:$0x77] %v1029_v30 }
 0x3d6   : > { %1034 = vst [vmem:[%s164_s30 + $0x8] sm:$0x77] %v1030_v31 }
 0x3d7   : > { %1362 = shalt.err (!%p1359_p3)
}
 0x3d8   : > { %s1363_s17 = scalar_lea.hbm %s1620_s7, 256  ;;  %s1367_s24 = scalar_lea.hbm %s1665_s3, 512 }
 0x3d9   : > { %p1364_p4 = scmp.ne.s32.totalorder %s1620_s7, %s1363_s17  ;;  %p1368_p9 = scmp.lt.u32.totalorder %s1620_s7, %s1665_s3 }
 0x3da   : > { %p1369_p10 = scmp.lt.u32.totalorder %s1367_s24, %s1363_s17  ;;  %p1371_p12 = scmp.lt.u32.totalorder %s1363_s17, %s1620_s7 }
 0x3db   : > { %p1365_p7 = pnand %p1364_p4, %p1477_p5 }
 0x3dc   : > { %p1370_p11 = por %p1369_p10, %p1368_p9 }
 0x3dd   : > { %p1366_p8 = pneg %p1365_p7 }
 0x3de   : > { %p1372_p13 = por %p1371_p12, %p1370_p11 }
 0x3e0   : > { %p1373_p0 = pnand %p1372_p13, %p1366_p8 }
 0x3e2   : > { %1376 = shalt.err (!%p1373_p0)
}
 0x3e3   : > { %1200 = dma.vmem_to_hbm [thread:$0]  (%p1477_p5), %s1622_s4, 256, %s1620_s7, %s1036_s8  }
 0x3e4 PF: > { %p1206_p1 = scmp.ge.s32.totalorder %s1411_s15, 2  ;;  %s1062_s27 = sand.u32 1, %s1399_s12  }
 0x3e5   : > { %s1063_s28 = scalar_lea.sflag [#allocation3], %s1062_s27 }
 0x3e6   : > { %p1203_p2 = pnand %p1206_p1, %p1481_p6 }
 0x3e8   : > { %1394 = dma.done.wait (!%p1203_p2), %s1063_s28, 256  }
 0x3e9   : > { %1396 = vsyncadd (!%p1203_p2), %s1063_s28, 4294967040  ;;  %p13_p3 = scmp.ge.s32.totalorder %s1464_s18, 4   ;;  %s1668_s12 = smov %s1403_s13 }
 0x3ea   : > { %s1669_s13 = smov %s1407_s14  ;;  %s1670_s14 = smov %s1475_s21 }
 0x3eb   : > { %s1671_s15 = smov %s1464_s18  ;;  %15 = sbr.rel (!%p13_p3) target bundleno = 3 (0x3), region = 67 }
 0x3f2   :  { %1068 = vsyncpa [#allocation3], 1 }
 0x3f3   :  { %1070 = vsyncpa [#allocation3 + $0x1], 1 }

</bundles_post_ra>
